<compile_context>
chip_gen: v7x
topology: tpu7x:2x2x1
jax: 0.10.0
libtpu: 0.0.40
codegen_flags: <defaults>
</compile_context>

<pallas_src>
import functools

import jax
import jax.numpy as jnp
from jax.experimental import pallas as pl
from jax.experimental.pallas import tpu as pltpu


def _simple_gradient_kernel(tcls_ref, x_ref, w_ref, sal_ref, part_ref, acc_ref):
    # tcls_ref: SMEM int32 [1]       scalar-prefetched target class index
    # x_ref:    VMEM f32 [B, TD]     current D-tile of the flattened input
    # w_ref:    VMEM f32 [NC, TD]    current D-tile of the weight matrix
    # sal_ref:  VMEM f32 [1, TD]     output tile: row W[target]
    # part_ref: VMEM f32 [1, B, NC]  per-core partial logits (written once)
    # acc_ref:  VMEM f32 [B, NC]     scratch: logit accumulator across D tiles
    d = pl.program_id(1)

    @pl.when(d == 0)
    def _():
        acc_ref[...] = jnp.zeros_like(acc_ref)

    # Partial logits for this D tile: x[B, TD] . W[NC, TD]^T -> [B, NC].
    # (B and NC are tiny; MXU utilization is irrelevant -- the binding resource
    # is the HBM stream of W / x / sal, which the D tiling keeps pipelined.)
    acc_ref[...] += jax.lax.dot_general(
        x_ref[...], w_ref[...], (((1,), (1,)), ((), ())),
        preferred_element_type=jnp.float32)

    # Saliency tile: dynamic slice of row `t` of the W tile (the broadcast over
    # the batch happens in the consumer, not in the kernel / HBM stream).
    t = tcls_ref[0]
    sal_ref[...] = w_ref[pl.ds(t, 1), :]

    # Store this core's partial logits once, on the last D tile.
    @pl.when(d == pl.num_programs(1) - 1)
    def _():
        part_ref[...] = acc_ref[...][None, :, :]


def _pallas_forward(tcls, x_in, w_in, *, td, ncores):
    B, d_pad = x_in.shape
    nc = w_in.shape[0]
    tiles_per_core = (d_pad // td) // ncores

    # Memory-bound custom call: tell XLA roughly what it costs.
    cost = pl.CostEstimate(
        flops=2 * B * nc * d_pad,
        transcendentals=0,
        bytes_accessed=4 * (B * d_pad + nc * d_pad + d_pad + ncores * B * nc),
    )

    sal_row, part = pl.pallas_call(
        _simple_gradient_kernel,
        out_shape=(
            jax.ShapeDtypeStruct((1, d_pad), jnp.float32),
            jax.ShapeDtypeStruct((ncores, B, nc), jnp.float32),
        ),
        grid_spec=pltpu.PrefetchScalarGridSpec(
            num_scalar_prefetch=1,
            grid=(ncores, tiles_per_core),
            in_specs=[
                pl.BlockSpec((B, td), lambda c, d, t: (0, c * tiles_per_core + d)),
                pl.BlockSpec((nc, td), lambda c, d, t: (0, c * tiles_per_core + d)),
            ],
            out_specs=[
                pl.BlockSpec((1, td), lambda c, d, t: (0, c * tiles_per_core + d)),
                pl.BlockSpec((1, B, nc), lambda c, d, t: (c, 0, 0)),
            ],
            scratch_shapes=[pltpu.VMEM((B, nc), jnp.float32)],
        ),
        compiler_params=pltpu.CompilerParams(
            # D (inner axis) is the logits-reduction axis -> "arbitrary".
            # The core axis is "parallel" -> sharded across TensorCores on v7x.
            dimension_semantics=("parallel", "arbitrary"),
            # Large tiles can exceed v5e's 16 MiB default scoped VMEM; 32 MiB is
            # safe on every generation (v7x physical VMEM is 64 MiB per core).
            vmem_limit_bytes=32 * 1024 * 1024,
        ),
        cost_estimate=cost,
    )(tcls, x_in, w_in)
    return sal_row, part


@functools.partial(jax.jit,
                   static_argnames=("td", "ncores", "d_valid", "use_argmax"))
def _simple_gradient_jit(tcls, x_in, w_in, b2d, *, td, ncores, d_valid,
                         use_argmax):
    sal_row, part = _pallas_forward(tcls, x_in, w_in, td=td, ncores=ncores)
    logits = jnp.sum(part, axis=0) + b2d       # (B, NC): combine per-core slabs
    probs = jax.nn.softmax(logits, axis=1)     # exact softmax, off the hot loop
    if use_argmax:
        # PyTorch path: target = argmax(net(x)) (implies B == 1). Replace the
        # kernel's dummy saliency row with a single-row gather of W (D*4 bytes)
        # instead of streaming all of W through HBM a second time.
        t = jnp.argmax(logits[0]).astype(jnp.int32)
        sal_row = w_in[t][None, :]
    sal_row = sal_row[:, :d_valid]
    return sal_row, probs


def _round_up(v, m):
    return (v + m - 1) // m * m


def _choose_tile(d, b, nc):
    """Pick the D-tile width against a VMEM budget; prefer divisors of D (no pad)."""
    def pad8(v):
        return _round_up(max(v, 1), 8)

    # Double-buffered per-step footprint of the x / W / sal tiles (f32, sublane
    # padded to 8 rows).  Kept well under the 32 MiB scoped limit we request.
    per_col_bytes = 2 * (pad8(b) + pad8(nc) + 8) * 4
    budget_cols = min((16 * 1024 * 1024) // per_col_bytes, 65536)
    budget_cols = max(128, budget_cols - budget_cols % 128)
    if d <= budget_cols:
        return d, d                       # single tile, no padding needed
    for td in range(budget_cols, 127, -128):
        if d % td == 0:
            return td, d                  # largest 128-multiple divisor: no pad
    # Fallback (rare: D has no 128-multiple divisor under the budget): pad D up
    # to a multiple of the budget tile.  Padded W/x columns are zeros so the
    # logits are unaffected; padded saliency columns are sliced off afterwards.
    td = budget_cols
    return td, _round_up(d, td)


def simple_gradient(x, w, b, target_cls=None):
    """JAX/Pallas equivalent of SimpleGradient.forward (sec_ord=False).

    x: [B, C, H, W] float32, w: [NUM_CLASSES, D], b: [NUM_CLASSES]
    Returns (sal [B, C, H, W], accu [B, NUM_CLASSES]).
    """
    B, C, H, W_ = x.shape
    D = C * H * W_
    nc = w.shape[0]
    x_flat = x.reshape(B, D).astype(jnp.float32)
    w = w.astype(jnp.float32)
    b2d = b.reshape(1, -1).astype(jnp.float32)
    # TODO(synk): optionally stream x / W in bfloat16 (f32 accumulation) for up
    # to ~2x HBM-bandwidth headroom if reduced saliency precision is acceptable.

    td, d_pad = _choose_tile(D, B, nc)
    if d_pad != D:
        x_in = jnp.pad(x_flat, ((0, 0), (0, d_pad - D)))
        w_in = jnp.pad(w, ((0, 0), (0, d_pad - D)))
    else:
        x_in, w_in = x_flat, w

    num_tiles = d_pad // td
    # Split the D stream across the two TensorCores on v7x (megacore); on
    # single-TensorCore chips this is just an extra (free) loop level.
    ncores = 2 if (num_tiles >= 2 and num_tiles % 2 == 0) else 1

    use_argmax = target_cls is None
    if use_argmax:
        tcls = jnp.zeros((1,), jnp.int32)  # dummy; saliency row is re-gathered
    else:
        # Clamp to avoid silent out-of-bounds VMEM reads inside the kernel.
        tcls = jnp.clip(jnp.asarray(target_cls, dtype=jnp.int32), 0, nc - 1)
        tcls = tcls.reshape((1,))

    sal_row, probs = _simple_gradient_jit(
        tcls, x_in, w_in, b2d, td=td, ncores=ncores, d_valid=D,
        use_argmax=use_argmax)

    # Broadcast the single saliency row to the batch in the consumer.
    sal = jnp.broadcast_to(sal_row, (B, D)).reshape(B, C, H, W_)
    return sal, probs


if __name__ == "__main__":
    B, C, H, W = 2, 4, 16, 16
    NUM_CLASSES = 10
    D = C * H * W

    key = jax.random.PRNGKey(0)
    kx, kw, kb = jax.random.split(key, 3)
    x = jax.random.normal(kx, (B, C, H, W), dtype=jnp.float32)
    w = jax.random.normal(kw, (NUM_CLASSES, D), dtype=jnp.float32) * 0.02
    b = jax.random.normal(kb, (NUM_CLASSES,), dtype=jnp.float32) * 0.01

    target_cls = 3
    sal, accu = simple_gradient(x, w, b, target_cls=target_cls)
    sal = jax.block_until_ready(sal)
    accu = jax.block_until_ready(accu)

    # Lightweight correctness check against a pure-JAX reference.
    x_flat = x.reshape(B, D)
    logits_ref = x_flat @ w.T + b[None, :]
    probs_ref = jax.nn.softmax(logits_ref, axis=1)
    sal_ref = jnp.broadcast_to(w[target_cls][None, :], (B, D)).reshape(B, C, H, W)
    assert sal.shape == (B, C, H, W) and accu.shape == (B, NUM_CLASSES)
    assert jnp.allclose(sal, sal_ref, atol=1e-6), "saliency mismatch"
    assert jnp.allclose(accu, probs_ref, atol=1e-3, rtol=1e-3), "softmax mismatch"

    # Exercise the target_cls=None (argmax) path as well (B == 1 semantics) and
    # check saliency/probs consistency: sal must be W[argmax(probs)].
    sal2, accu2 = simple_gradient(x[:1], w, b, target_cls=None)
    sal2 = jax.block_until_ready(sal2)
    accu2 = jax.block_until_ready(accu2)
    t2 = int(jnp.argmax(accu2[0]))
    sal2_ref = w[t2].reshape(1, C, H, W)
    assert jnp.allclose(sal2, sal2_ref, atol=1e-6), "argmax-path saliency mismatch"

    print("KERNEL_OK")
</pallas_src>

<mosaic_0001>
module attributes {stable_mosaic.version = 11 : i64} {
  func.func @_simple_gradient_kernel(%arg0: i32, %arg1: i32, %arg2: memref<1xi32, #tpu.memory_space<smem>>, %arg3: memref<2x1024xf32, #tpu.memory_space<vmem>>, %arg4: memref<10x1024xf32, #tpu.memory_space<vmem>>, %arg5: memref<1x1024xf32, #tpu.memory_space<vmem>>, %arg6: memref<1x2x10xf32, #tpu.memory_space<vmem>>, %arg7: memref<2x10xf32, #tpu.memory_space<vmem>>) attributes {dimension_semantics = [#tpu.dimension_semantics<parallel>, #tpu.dimension_semantics<arbitrary>], iteration_bounds = array<i64: 1, 1>, scalar_prefetch = 1 : i64, scratch_operands = 1 : i64, tpu.core_type = #tpu.core_type<tc>, window_params = [{transform_indices = @transform_0, window_bounds = array<i64: 2, 1024>}, {transform_indices = @transform_1, window_bounds = array<i64: 10, 1024>}, {transform_indices = @transform_2, window_bounds = array<i64: 1, 1024>}, {transform_indices = @transform_3, window_bounds = array<i64: 1, 2, 10>}]} {
    %c0_i32 = arith.constant 0 : i32
    %0 = arith.cmpi eq, %arg1, %c0_i32 : i32
    %1 = arith.extui %0 : i1 to i32
    %c0_i32_0 = arith.constant 0 : i32
    %2 = arith.cmpi ne, %1, %c0_i32_0 : i32
    scf.if %2 {
      %cst_14 = arith.constant 0.000000e+00 : f32
      %16 = vector.broadcast %cst_14 : f32 to vector<2x10xf32>
      %c0_15 = arith.constant 0 : index
      %c0_16 = arith.constant 0 : index
      %17 = vector.load %arg7[%c0_15, %c0_16] : memref<2x10xf32, #tpu.memory_space<vmem>>, vector<2x10xf32>
      tpu.vector_store %arg7[%c0_15, %c0_16], %16 {strides = array<i32>} : memref<2x10xf32, #tpu.memory_space<vmem>>, vector<2x10xf32>,
    } else {
    }
    %c0 = arith.constant 0 : index
    %c0_1 = arith.constant 0 : index
    %3 = vector.load %arg7[%c0, %c0_1] : memref<2x10xf32, #tpu.memory_space<vmem>>, vector<2x10xf32>
    %c0_2 = arith.constant 0 : index
    %c0_3 = arith.constant 0 : index
    %4 = vector.load %arg3[%c0_2, %c0_3] : memref<2x1024xf32, #tpu.memory_space<vmem>>, vector<2x1024xf32>
    %c0_4 = arith.constant 0 : index
    %c0_5 = arith.constant 0 : index
    %5 = vector.load %arg4[%c0_4, %c0_5] : memref<10x1024xf32, #tpu.memory_space<vmem>>, vector<10x1024xf32>
    %cst = arith.constant dense<0.000000e+00> : vector<2x10xf32>
    %6 = tpu.matmul %4, %5, %cst {dimension_numbers = #tpu.dot_dimension_numbers<[1], [1], [0], [0], [0, 0, 1, 0], [], []>} : vector<2x1024xf32>, vector<10x1024xf32>, vector<2x10xf32> -> vector<2x10xf32>
    %7 = arith.addf %3, %6 : vector<2x10xf32>
    %c0_6 = arith.constant 0 : index
    %c0_7 = arith.constant 0 : index
    %8 = vector.load %arg7[%c0_6, %c0_7] : memref<2x10xf32, #tpu.memory_space<vmem>>, vector<2x10xf32>
    tpu.vector_store %arg7[%c0_6, %c0_7], %7 {strides = array<i32>} : memref<2x10xf32, #tpu.memory_space<vmem>>, vector<2x10xf32>,
    %c0_8 = arith.constant 0 : index
    %9 = memref.load %arg2[%c0_8] : memref<1xi32, #tpu.memory_space<smem>>
    %10 = arith.index_cast %9 : i32 to index
    %c0_9 = arith.constant 0 : index
    %11 = vector.load %arg4[%10, %c0_9] : memref<10x1024xf32, #tpu.memory_space<vmem>>, vector<1x1024xf32>
    %c0_10 = arith.constant 0 : index
    %c0_11 = arith.constant 0 : index
    %12 = vector.load %arg5[%c0_10, %c0_11] : memref<1x1024xf32, #tpu.memory_space<vmem>>, vector<1x1024xf32>
    tpu.vector_store %arg5[%c0_10, %c0_11], %11 {strides = array<i32>} : memref<1x1024xf32, #tpu.memory_space<vmem>>, vector<1x1024xf32>,
    %c0_i32_12 = arith.constant 0 : i32
    %13 = arith.cmpi eq, %arg1, %c0_i32_12 : i32
    %14 = arith.extui %13 : i1 to i32
    %c0_i32_13 = arith.constant 0 : i32
    %15 = arith.cmpi ne, %14, %c0_i32_13 : i32
    scf.if %15 {
      %c0_14 = arith.constant 0 : index
      %c0_15 = arith.constant 0 : index
      %16 = vector.load %arg7[%c0_14, %c0_15] : memref<2x10xf32, #tpu.memory_space<vmem>>, vector<2x10xf32>
      %17 = vector.shape_cast %16 : vector<2x10xf32> to vector<1x2x10xf32>
      %c0_16 = arith.constant 0 : index
      %c0_17 = arith.constant 0 : index
      %c0_18 = arith.constant 0 : index
      %18 = vector.load %arg6[%c0_16, %c0_17, %c0_18] : memref<1x2x10xf32, #tpu.memory_space<vmem>>, vector<1x2x10xf32>
      tpu.vector_store %arg6[%c0_16, %c0_17, %c0_18], %17 {strides = array<i32>} : memref<1x2x10xf32, #tpu.memory_space<vmem>>, vector<1x2x10xf32>,
    } else {
    }
    return
  }
  func.func @transform_0(%arg0: i32, %arg1: i32, %arg2: memref<1xi32, #tpu.memory_space<smem>>) -> (i32, i32) {
    %c1_i32 = arith.constant 1 : i32
    %0 = arith.muli %arg0, %c1_i32 : i32
    %1 = arith.addi %0, %arg1 : i32
    %c0_i32 = arith.constant 0 : i32
    %c0_i32_0 = arith.constant 0 : i32
    return %c0_i32, %1 : i32, i32
  }
  func.func @transform_1(%arg0: i32, %arg1: i32, %arg2: memref<1xi32, #tpu.memory_space<smem>>) -> (i32, i32) {
    %c1_i32 = arith.constant 1 : i32
    %0 = arith.muli %arg0, %c1_i32 : i32
    %1 = arith.addi %0, %arg1 : i32
    %c0_i32 = arith.constant 0 : i32
    %c0_i32_0 = arith.constant 0 : i32
    return %c0_i32, %1 : i32, i32
  }
  func.func @transform_2(%arg0: i32, %arg1: i32, %arg2: memref<1xi32, #tpu.memory_space<smem>>) -> (i32, i32) {
    %c1_i32 = arith.constant 1 : i32
    %0 = arith.muli %arg0, %c1_i32 : i32
    %1 = arith.addi %0, %arg1 : i32
    %c0_i32 = arith.constant 0 : i32
    %c0_i32_0 = arith.constant 0 : i32
    return %c0_i32, %1 : i32, i32
  }
  func.func @transform_3(%arg0: i32, %arg1: i32, %arg2: memref<1xi32, #tpu.memory_space<smem>>) -> (i32, i32, i32) {
    %c0_i32 = arith.constant 0 : i32
    %c0_i32_0 = arith.constant 0 : i32
    %c0_i32_1 = arith.constant 0 : i32
    return %arg0, %c0_i32, %c0_i32_0 : i32, i32, i32
  }
}

</mosaic_0001>

<bundles_post_ra>
// kernel: _simple_gradient_jit.1
= control target key start
LH: loop header
LB: loop body
LE: loop exit
PB: predicated region body
PF: predicated region fallthrough
CT: control target
= control target key end

     0   :  { %11 = vsyncpa [#allocation6], 0  ;;  %s640_s0 = inlined_call_operand.<no memory space> [shape: s32[1], index: 0, kind: input, shape index: {}]   ;;  %s641_s1 = inlined_call_operand.hbm [shape: f32[2,1024], index: 1, kind: input, shape index: {}]   ;;  %s642_s2 = inlined_call_operand.hbm [shape: f32[10,1024], index: 2, kind: input, shape index: {}]   ;;  %s643_s3 = inlined_call_operand.hbm [shape: f32[1,1024], index: 3, kind: output, shape index: {0}]   ;;  %s644_s4 = inlined_call_operand.vmem [shape: f32[1,2,10], index: 4, kind: output, shape index: {1}]  }
   0x1   :  { %12 = vsyncpa [#allocation9], 0 }
   0x2   :  { %13 = vsyncpa [#allocation7], 0  ;;  %s553_s15 = smov [#allocation5]   ;;  %s554_s17 = smov [#allocation8]  }
   0x3   :  { %s24_s16 = sshll.u32 %s553_s15, 4  ;;  %s37_s18 = sshll.u32 %s554_s17, 4  ;;  %s25_s16 = int_to_ptr.vmem [resolvable:$true] %s24_s16  ;;  %s585_s18 = int_to_ptr.vmem [resolvable:$true] %s37_s18 }
   0x4   :  { %s481_s21 = scalar_lea.hbm %s641_s1, 256 }
   0x5   :  { %p482_p0 = scmp.ne.s32.totalorder %s641_s1, %s481_s21  ;;  %p485_p1 = scmp.lt.u32.totalorder %s481_s21, %s641_s1 }
   0x7   :  { %p487_p2 = pnand %p485_p1, %p482_p0 }
   0x9   :  { %490 = shalt.err (!%p487_p2)
}
   0xa   :  { %s491_s26 = scalar_lea.vmem %s25_s16, 256  ;;  %p496_p4 = scmp.lt.s32.totalorder %s25_s16, %s25_s16 }
   0xb   :  { %p492_p3 = scmp.ne.s32.totalorder %s25_s16, %s491_s26  ;;  %p497_p5 = scmp.lt.s32.totalorder %s491_s26, %s491_s26 }
   0xd   :  { %p498_p6 = por %p497_p5, %p496_p4 }
   0xf   :  { %p499_p7 = pnand %p498_p6, %p492_p3 }
  0x11   :  { %502 = shalt.err (!%p499_p7)
}
  0x12   :  { %27 = dma.hbm_to_vmem [thread:$0]  %s641_s1, 256, %s25_s16, [#allocation6]  }
  0x13   :  { %s503_s5 = scalar_lea.hbm %s642_s2, 2048 }
  0x14   :  { %p504_p8 = scmp.ne.s32.totalorder %s642_s2, %s503_s5  ;;  %p507_p9 = scmp.lt.u32.totalorder %s503_s5, %s642_s2 }
  0x16   :  { %p509_p10 = pnand %p507_p9, %p504_p8 }
  0x18   :  { %512 = shalt.err (!%p509_p10)
}
  0x19   :  { %s513_s10 = scalar_lea.vmem %s585_s18, 2048  ;;  %p518_p12 = scmp.lt.s32.totalorder %s585_s18, %s585_s18 }
  0x1a   :  { %p514_p11 = scmp.ne.s32.totalorder %s585_s18, %s513_s10  ;;  %p519_p13 = scmp.lt.s32.totalorder %s513_s10, %s513_s10 }
  0x1c   :  { %p520_p0 = por %p519_p13, %p518_p12 }
  0x1e   :  { %p521_p1 = pnand %p520_p0, %p514_p11 }
  0x20   :  { %524 = shalt.err (!%p521_p1)
}
  0x21   :  { %s555_s1 = smov 1024   ;;  %s556_s11 = smov 64  }
  0x22   :  { %43 = dma.hbm_to_vmem [thread:$0]  %s642_s2, 2048, %s585_s18, [#allocation9], %s555_s1, %s555_s1, %s556_s11  }
  0x23   :  { %547 = dma.done.wait [#allocation6], 256  }
  0x24   :  { %548 = vsyncadd [#allocation6], 4294967040 }
  0x25   :  { %549 = dma.done.wait [#allocation9], 2048  }
  0x26   :  { %550 = vsyncadd [#allocation9], 4294965248  ;;  %v87_v0 = vlaneseq  ;;  %v557_v1 = vmov 1983009808   ;;  %v66_v6 = vld [vmem:[#allocation8 + $0x8] sm:$0xff]  ;;  %v65_v8 = vld [vmem:[#allocation8] sm:$0xff] }
  0x27   :  { %v85_v2 = vunpack.c.l.s4 %v557_v1  ;;  %v74_v7 = vld [vmem:[#allocation8 + $0x48] sm:$0x3]  ;;  %v73_v10 = vld [vmem:[#allocation8 + $0x40] sm:$0x3]  ;;  %v68_v11 = vld [vmem:[#allocation8 + $0x18] sm:$0xff]  ;;  %vm60_vm0 = vcmask 74752  }
  0x28   :  { %v88_v3 = vshrl.u32 %v87_v0, 7  ;;  %v456_v9 = vpack.c.bf16 %v74_v7, %v66_v6  ;;  %v76_v12 = vld [vmem:[#allocation8 + $0x58] sm:$0x3]  ;;  %v458_v13 = vpack.c.bf16 %v73_v10, %v65_v8  ;;  %v67_v15 = vld [vmem:[#allocation8 + $0x10] sm:$0xff]  ;;  %v70_v21 = vld [vmem:[#allocation8 + $0x28] sm:$0xff]  ;;  %v558_v42 = vmov 0.0  }
  0x29   :  { %v86_v4 = vunpack.c.0.s8 %v85_v2  ;;  %v460_v14 = vpack.c.bf16 %v76_v12, %v68_v11  ;;  %v75_v16 = vld [vmem:[#allocation8 + $0x50] sm:$0x3]  ;;  %v78_v22 = vld [vmem:[#allocation8 + $0x68] sm:$0x3]  ;;  %v72_v24 = vld [vmem:[#allocation8 + $0x38] sm:$0xff]  ;;  %s409_s15 = sshra.s32 %s640_s0, 3 }
  0x2a   :  { %v63_v17 = vld [vmem:[#allocation5] sm:$0xff]  ;;  %457 = vmatprep.subr.bf16.mxu0 %v456_v9  ;;  %v462_v18 = vpack.c.bf16 %v75_v16, %v67_v15  ;;  %v464_v23 = vpack.c.bf16 %v78_v22, %v70_v21  ;;  %v80_v25 = vld [vmem:[#allocation8 + $0x78] sm:$0x3]  ;;  %v69_v28 = vld [vmem:[#allocation8 + $0x20] sm:$0xff]  ;;  %61 = vst.msk [vmem:[#allocation2] sm:$0x3] %vm60_vm0, %v558_v42 }
  0x2b   :  { %v89_v5 = vsub.s32 %v86_v4, %v88_v3  ;;  %v83_v20 = vcombine.high %v63_v17, %v63_v17  ;;  %459 = vmatpush1.bf16.xpose.msra.mxu0 %v458_v13  ;;  %461 = vmatprep.subr.bf16.mxu1 %v460_v14  ;;  %v77_v29 = vld [vmem:[#allocation8 + $0x60] sm:$0x3]  ;;  %v468_v30 = vpack.c.bf16 %v80_v25, %v72_v24  ;;  %v64_v31 = vld [vmem:[#allocation5 + $0x8] sm:$0xff]  ;;  %v71_v32 = vld [vmem:[#allocation8 + $0x30] sm:$0xff]  ;;  %s412_s18 = sand.u32 7, %s640_s0  ;;  %s455_s19 = sshll.u32 %s409_s15, 6 }
  0x2c   :  { %463 = vmatpush1.bf16.xpose.msra.mxu1 %v462_v18  ;;  %465 = vmatprep.subr.bf16.mxu0 %v464_v23  ;;  %v79_v33 = vld [vmem:[#allocation8 + $0x70] sm:$0x3]  ;;  %v100_v35 = vcombine.high %v64_v31, %v64_v31  ;;  %v466_v37 = vpack.c.bf16 %v77_v29, %v69_v28  ;;  %s415_s20 = sadd.s32 %s455_s19, %s412_s18  ;;  %s559_s22 = smov [#allocation10]  }
  0x2d   :  { %v90_v19 = vrot.slane %v63_v17, %v89_v5  ;;  %v97_v27 = vrot.slane %v83_v20, %v89_v5  ;;  %v107_v34 = vrot.slane %v64_v31, %v89_v5  ;;  %469 = vmatprep.subr.bf16.mxu1 %v468_v30  ;;  %v470_v39 = vpack.c.bf16 %v79_v33, %v71_v32  ;;  %s416_s21 = scalar_lea.vmem [#allocation8], %s415_s20  ;;  %s436_s23 = sshll.u32 %s559_s22, 4  ;;  %s437_s23 = int_to_ptr.vmem [resolvable:$true] %s436_s23 }
  0x2e   :  { %v114_v38 = vrot.slane %v100_v35, %v89_v5  ;;  %v417_v43 = vld [vmem:[%s416_s21] ss:$8 sm:$0xf]  ;;  %s525_s24 = scalar_lea.vmem %s437_s23, 128  ;;  %p530_p3 = scmp.lt.s32.totalorder %s437_s23, %s437_s23 }
  0x2f   :  { %v98_v26 = vcombine.high %v90_v19, %v90_v19  ;;  %v99_v36 = vcombine.high %v97_v27, %v97_v27  ;;  %v115_v40 = vcombine.high %v107_v34, %v107_v34  ;;  %v418_v44 = vld [vmem:[%s416_s21] ss:$8 sm:$0xf0]  ;;  %p526_p2 = scmp.ne.s32.totalorder %s437_s23, %s525_s24  ;;  %p531_p4 = scmp.lt.s32.totalorder %s525_s24, %s525_s24 }
  0x30   :  { %v116_v41 = vcombine.high %v114_v38, %v114_v38  ;;  %v419_v45 = vor.u32 %v418_v44, %v417_v43 }
  0x31   :  { %189 = vmatprep.mubr.f32.mxu0 %v98_v26  ;;  %259 = vmatprep.mubr.f32.mxu1 %v99_v36  ;;  %p532_p5 = por %p531_p4, %p530_p3 }
  0x32   :  { %190 = vmatmul.mubr.f32.vlgmr.msra.gmra.mrb[0].mxu0 %v90_v19  ;;  %420 = vst [vmem:[#allocation10] sm:$0xff] %v419_v45 }
  0x33   :  { %260 = vmatmul.mubr.f32.vlgmr.msra.gmra.mrb[0].mxu1 %v97_v27  ;;  %467 = vmatpush1.bf16.xpose.msra.mxu0 %v466_v37  ;;  %p533_p6 = pnand %p532_p5, %p526_p2 }
  0x34   :  { %471 = vmatpush1.bf16.xpose.msra.mxu1 %v470_v39  ;;  %329 = vmatprep.mubr.f32.mxu0 %v115_v40 }
  0x35   :  { %399 = vmatprep.mubr.f32.mxu1 %v116_v41 }
  0x3a   :  { %330 = vmatmul.mubr.f32.vlgmr.msra.gmra.mrb[2].mxu0 %v107_v34 }
  0x3b   :  { %400 = vmatmul.mubr.f32.vlgmr.msra.gmra.mrb[2].mxu1 %v114_v38 }
  0x3c   :  { %536 = shalt.err (!%p533_p6)
}
  0x3d   :  { %s537_s0 = scalar_lea.hbm %s643_s3, 128 }
  0x3e   :  { %p538_p7 = scmp.ne.s32.totalorder %s643_s3, %s537_s0  ;;  %p541_p8 = scmp.lt.u32.totalorder %s537_s0, %s643_s3 }
  0x40   :  { %p543_p9 = pnand %p541_p8, %p538_p7 }
  0x42   :  { %546 = shalt.err (!%p543_p9)
}
  0x43   :  { %439 = dma.vmem_to_hbm [thread:$0]  %s437_s23, 128, %s643_s3, [#allocation7]   ;;  %v62_v55 = vld [vmem:[#allocation2] sm:$0x3] }
 0x105   :  { %v191_v46 = vpop.f32.mrb[0].mxu0 }
 0x106   :  { %v193_v47 = vpop.f32.mrb[1].mxu0  ;;  %v261_v48 = vpop.f32.mrb[0].mxu1 }
 0x107   :  { %v262_v49 = vadd.f32 %v261_v48, %v191_v46  ;;  %v263_v50 = vpop.f32.mrb[1].mxu1 }
 0x10d   :  { %v331_v51 = vpop.f32.mrb[2].mxu0 }
 0x10e   :  { %v332_v52 = vadd.f32 %v331_v51, %v262_v49  ;;  %v333_v53 = vpop.f32.mrb[3].mxu0  ;;  %v401_v54 = vpop.f32.mrb[2].mxu1 }
 0x10f   :  { %v403_v56 = vpop.f32.mrb[3].mxu1 }
 0x110   :  { %v402_v57 = vadd.f32 %v401_v54, %v332_v52 }
 0x112   :  { %v405_v58 = vadd.f32 %v402_v57, %v62_v55 }
 0x114   :  { %407 = vst.msk [vmem:[#allocation2] sm:$0x3] %vm60_vm0, %v405_v58 }
 0x11b   :  { %v424_v59 = vld [vmem:[#allocation2] sm:$0x3] }
 0x11c   :  { %425 = vst.msk [vmem:[%s644_s4] sm:$0x3] %vm60_vm0, %v424_v59 }
 0x11d   :  { %551 = dma.done.wait [#allocation7], 128  }
 0x11e   :  { %552 = vsyncadd [#allocation7], 4294967168 }
 0x11f   :  { %447 = vsyncpa [#allocation6], 1 }
 0x120   :  { %448 = vsyncpa [#allocation9], 1 }
 0x121   :  { %449 = vsyncpa [#allocation7], 1 }

</bundles_post_ra>
